<compile_context>
chip_gen: v7x
topology: tpu7x:2x2x1
jax: 0.10.0
libtpu: 0.0.40
codegen_flags: <defaults>
</compile_context>

<pallas_src>
import functools

import jax
import jax.numpy as jnp
from jax import lax
from jax.experimental import pallas as pl
from jax.experimental.pallas import tpu as pltpu


HPAD = 8  # sublane-aligned halo rows above/below the image inside the scratch


def make_divisible(v, divisor=8, min_value=None):
    if min_value is None:
        min_value = divisor
    new_v = max(min_value, int(v + divisor / 2) // divisor * divisor)
    if new_v < 0.9 * v:
        new_v += divisor
    return new_v


def _silu(x):
    # x * sigmoid(x); the reciprocal runs on the EUP approx path (off the VALU slot).
    return x * pl.reciprocal(1.0 + jnp.exp(-x), approx=True)


# ----------------------------------------------------------------------------- roll probe
_ROLL_SIGN = None


def _pltpu_roll_sign():
    """Calibrate pltpu.roll's rotation direction against jnp.roll with a tiny probe."""
    global _ROLL_SIGN
    if _ROLL_SIGN is not None:
        return _ROLL_SIGN

    def probe(x_ref, o_ref):
        o_ref[...] = pltpu.roll(x_ref[...], shift=1, axis=1)

    x = jnp.arange(8 * 128, dtype=jnp.float32).reshape(8, 128)
    out = pl.pallas_call(probe, out_shape=jax.ShapeDtypeStruct((8, 128), jnp.float32))(x)
    if bool(jnp.array_equal(out, jnp.roll(x, 1, axis=1))):
        _ROLL_SIGN = 1
    elif bool(jnp.array_equal(out, jnp.roll(x, -1, axis=1))):
        _ROLL_SIGN = -1
    else:
        raise AssertionError("unexpected pltpu.roll semantics")
    return _ROLL_SIGN


# ----------------------------------------------------------------------------- kernel
def _inverted_residual_kernel(
    x_ref,          # (Nb, H, W*Cin)            packed input block
    w1_ref,         # (W*Cin, W*hidden) bf16    block-diag exp_1x1 weight * s1 (dummy if !expand)
    b1_ref,         # (1, W*hidden)             folded BN1 shift (tiled along W)
    wdw_ref,        # (9, W*hidden)             depthwise 3x3 taps * s2, boundary masks folded in
    b2_ref,         # (1, W*hidden)             folded BN2 shift (tiled along W)
    w3_ref,         # (W*hidden, Wo*Cout) bf16  red_1x1 block weight * s3 (folds W-stride)
    b3_ref,         # (1, Wo*Cout)              folded BN3 shift (tiled along Wo)
    out_ref,        # (Nb, Ho, Wo*Cout)
    pad_ref,        # VMEM scratch (Nb, H + 2*HPAD, W*hidden) f32
    *, H, W, Ho, stride, dilation, hidden, expand, use_res, roll_sign,
):
    Nb = x_ref.shape[0]
    WH = W * hidden
    C = dilation * hidden          # lane shift for one dilated column step

    x2 = x_ref[...].reshape(Nb * H, x_ref.shape[2])       # (Nb*H, W*Cin), lane dense

    # ---------------- exp_1x1 (1x1 conv, BN scale folded into weight) + bias + SiLU -----
    if expand:
        t1 = jnp.dot(x2.astype(jnp.bfloat16), w1_ref[...],
                     preferred_element_type=jnp.float32)   # (Nb*H, W*hidden)
        t1 = _silu(t1 + b1_ref[0])
    else:
        t1 = x2                                            # expand_ratio == 1: hidden == Cin

    # ---------------- depthwise 3x3 input staging --------------------------------------
    # Halo strips are re-zeroed every step (scratch is not guaranteed initialized and the
    # batch grid axis carries no state, so "parallel" stays safe); interior rows land at a
    # sublane-aligned offset and are fully overwritten each step.
    pad_ref[:, 0:HPAD, :] = jnp.zeros((Nb, HPAD, WH), jnp.float32)
    pad_ref[:, HPAD + H:, :] = jnp.zeros((Nb, HPAD, WH), jnp.float32)
    pad_ref[:, HPAD:HPAD + H, :] = t1.reshape(Nb, H, WH)

    # ---------------- depthwise 3x3 (masks + BN scale already folded into the taps) -----
    M = Nb * Ho

    def roll_lanes(v, shift):      # shift follows jnp.roll convention
        return pltpu.roll(v, shift=(roll_sign * shift) % WH, axis=1)

    acc = jnp.zeros((M, WH), jnp.float32)
    for kh in range(3):
        r0 = HPAD + (kh - 1) * dilation
        if stride == 1:
            rows = pad_ref[:, r0:r0 + Ho, :]
        else:
            rows = pad_ref[:, pl.ds(r0, Ho, stride), :]    # strided row subsample
        rows = rows.reshape(M, WH)
        acc = acc + rows * wdw_ref[3 * kh + 1]                     # kw = 1 (center)
        acc = acc + roll_lanes(rows, C) * wdw_ref[3 * kh + 0]      # kw = 0 (left tap)
        acc = acc + roll_lanes(rows, -C) * wdw_ref[3 * kh + 2]     # kw = 2 (right tap)

    t2 = _silu(acc + b2_ref[0])

    # ---------------- red_1x1 (1x1 conv, BN scale folded) + bias (no act) ---------------
    t3 = jnp.dot(t2.astype(jnp.bfloat16), w3_ref[...],
                 preferred_element_type=jnp.float32)        # (Nb*Ho, Wo*Cout)
    y = t3 + b3_ref[0]
    if use_res:
        y = y + x2                                          # f32 residual (exact)
    out_ref[...] = y.reshape(Nb, Ho, out_ref.shape[2])      # dense, aligned store


# ----------------------------------------------------------------------------- packing
def _block_diag(w, reps):
    """(a, b) -> (reps*a, reps*b) block-diagonal with identical blocks `w`."""
    a, b = w.shape
    eye = jnp.eye(reps, dtype=w.dtype)
    return (eye[:, None, :, None] * w[None, :, None, :]).reshape(reps * a, reps * b)


def _red_weight(w3, W, Wo, stride):
    """(W*hidden, Wo*Cout): block (j_in, j_out) = w3 iff j_in == j_out*stride."""
    hidden, Cout = w3.shape
    sel = (jnp.arange(W)[:, None] == (jnp.arange(Wo) * stride)[None, :]).astype(w3.dtype)
    return (sel[:, None, :, None] * w3[None, :, None, :]).reshape(W * hidden, Wo * Cout)


def pack_inverted_residual_params(w1, s1, b1, wdw, s2, b2, w3, s3, b3,
                                  *, W, stride, dilation):
    """Build the lane-dense packed operands ONCE per layer (BN scales + boundary masks folded in).

    w1  : (Cin, hidden) or None   exp_1x1 weight (None when expand_ratio == 1)
    wdw : (3, 3, hidden)          depthwise 3x3 weight
    w3  : (hidden, Cout)          red_1x1 weight
    s*/b*: per-channel folded BN scale/shift vectors
    """
    hidden = wdw.shape[-1]
    Cout = w3.shape[-1]
    Wo = (W - 1) // stride + 1
    WH = W * hidden
    C = dilation * hidden

    if w1 is not None:
        w1p = _block_diag(w1 * s1[None, :], W).astype(jnp.bfloat16)     # (W*Cin, W*hidden)
        b1p = jnp.tile(b1, W).reshape(1, WH).astype(jnp.float32)
    else:
        w1p = jnp.zeros((1, 1), jnp.bfloat16)
        b1p = jnp.zeros((1, 1), jnp.float32)

    # Depthwise taps: BN2 scale folded per channel, boundary masks folded per lane.
    wdw_s = (wdw * s2[None, None, :]).reshape(9, hidden)
    wdwp = jnp.tile(wdw_s, (1, W)).astype(jnp.float32)                  # (9, W*hidden)
    lane = jnp.arange(WH)
    keep_l = (lane >= C).astype(jnp.float32)        # valid lanes for kw=0 (col - dilation)
    keep_r = (lane < WH - C).astype(jnp.float32)    # valid lanes for kw=2 (col + dilation)
    row = jnp.arange(9)
    lane_mask = jnp.where((row % 3 == 0)[:, None], keep_l[None, :],
                          jnp.where((row % 3 == 2)[:, None], keep_r[None, :], 1.0))
    wdwp = wdwp * lane_mask
    b2p = jnp.tile(b2, W).reshape(1, WH).astype(jnp.float32)

    w3p = _red_weight(w3 * s3[None, :], W, Wo, stride).astype(jnp.bfloat16)  # (W*hidden, Wo*Cout)
    b3p = jnp.tile(b3, Wo).reshape(1, Wo * Cout).astype(jnp.float32)

    return dict(w1p=w1p, b1p=b1p, wdwp=wdwp, b2p=b2p, w3p=w3p, b3p=b3p)


# ----------------------------------------------------------------------------- wrapper
def _pick_batch_block(N, H, W, Cin, hidden, Cout, Ho, Wo):
    """Largest divisor of N such that Nb*H <= 512 (MXU M-occupancy without huge live ranges)
    and the per-step VMEM footprint stays within a conservative 24 MiB budget (portable to
    v7x's 64 MiB physical VMEM)."""
    WH = W * hidden

    def vmem_est(nb):
        scratch = nb * (H + 2 * HPAD) * WH * 4
        xblk = 2 * nb * H * W * Cin * 4                       # double-buffered input block
        oblk = 2 * nb * Ho * Wo * Cout * 4                    # double-buffered output block
        wts = 2 * (W * Cin * WH + WH * Wo * Cout) * 2         # double-buffered bf16 weights
        vecs = 2 * (11 * WH + Wo * Cout) * 4                  # bias / tap vectors
        return scratch + xblk + oblk + wts + vecs

    best = 1
    for nb in range(1, N + 1):
        if N % nb == 0 and nb * H <= 512 and vmem_est(nb) <= 24 * 2**20:
            best = nb
    return best, vmem_est(best)


def inverted_residual_pallas(x_nhwc, params, *, stride, dilation, expand_ratio):
    """InvertedResidual forward (inference-mode BN folded into packed weights/biases).

    x_nhwc : (N, H, W, Cin) f32
    params : dict from pack_inverted_residual_params (built once per layer)
    """
    N, H, W, Cin = x_nhwc.shape
    hidden = params["wdwp"].shape[1] // W
    expand = expand_ratio != 1
    if not expand:
        # Same implicit constraint as the PyTorch module (depthwise has hidden_dim chans).
        assert hidden == Cin, "expand_ratio == 1 requires make_divisible(Cin) == Cin"
    assert stride in (1, 2)
    assert 1 <= dilation <= HPAD and dilation < W
    Ho = (H - 1) // stride + 1
    Wo = (W - 1) // stride + 1
    Cout = params["b3p"].shape[1] // Wo
    use_res = (stride == 1) and (Cin == Cout)
    WH = W * hidden

    x_pack = x_nhwc.reshape(N, H, W * Cin)   # free fold of contiguous NHWC
    Nb, est = _pick_batch_block(N, H, W, Cin, hidden, Cout, Ho, Wo)
    grid = (N // Nb,)
    vmem_limit = int(min(max(2 * est, 32 * 2**20), 48 * 2**20))

    kernel = functools.partial(
        _inverted_residual_kernel,
        H=H, W=W, Ho=Ho, stride=stride, dilation=dilation, hidden=hidden,
        expand=expand, use_res=use_res, roll_sign=_pltpu_roll_sign(),
    )

    def const_spec(a):
        return pl.BlockSpec(a.shape, lambda n: (0,) * a.ndim)

    grid_spec = pltpu.PrefetchScalarGridSpec(
        num_scalar_prefetch=0,
        grid=grid,
        in_specs=[
            pl.BlockSpec((Nb, H, W * Cin), lambda n: (n, 0, 0)),
            const_spec(params["w1p"]), const_spec(params["b1p"]),
            const_spec(params["wdwp"]), const_spec(params["b2p"]),
            const_spec(params["w3p"]), const_spec(params["b3p"]),
        ],
        out_specs=pl.BlockSpec((Nb, Ho, Wo * Cout), lambda n: (n, 0, 0)),
        scratch_shapes=[pltpu.VMEM((Nb, H + 2 * HPAD, WH), jnp.float32)],
    )

    out = pl.pallas_call(
        kernel,
        out_shape=jax.ShapeDtypeStruct((N, Ho, Wo * Cout), jnp.float32),
        grid_spec=grid_spec,
        compiler_params=pltpu.CompilerParams(
            dimension_semantics=("parallel",),   # batch blocks are fully independent
            vmem_limit_bytes=vmem_limit),
    )(x_pack, params["w1p"], params["b1p"], params["wdwp"],
      params["b2p"], params["w3p"], params["b3p"])

    return out.reshape(N, Ho, Wo, Cout)


# ----------------------------------------------------------------------------- demo / check
if __name__ == "__main__":
    # Module config: InvertedResidual(in_channels=16, out_channels=16, stride=1, expand_ratio=2)
    N, Cin, H, W = 2, 16, 16, 16
    Cout, stride, dilation, expand_ratio = 16, 1, 1, 2
    hidden = make_divisible(int(round(Cin * expand_ratio)), 8)   # 32
    eps = 1e-5

    keys = jax.random.split(jax.random.PRNGKey(0), 8)
    x_nchw = jax.random.normal(keys[0], (N, Cin, H, W), jnp.float32)

    # PyTorch conv weight layouts (OIHW)
    w1_t = 0.1 * jax.random.normal(keys[1], (hidden, Cin, 1, 1), jnp.float32)   # exp_1x1
    wdw_t = 0.1 * jax.random.normal(keys[2], (hidden, 1, 3, 3), jnp.float32)    # depthwise
    w3_t = 0.1 * jax.random.normal(keys[3], (Cout, hidden, 1, 1), jnp.float32)  # red_1x1

    def bn_fold(k, Cc):
        k1, k2, k3, k4 = jax.random.split(k, 4)
        gamma = 1.0 + 0.1 * jax.random.normal(k1, (Cc,), jnp.float32)
        beta = 0.1 * jax.random.normal(k2, (Cc,), jnp.float32)
        mean = 0.1 * jax.random.normal(k3, (Cc,), jnp.float32)
        var = jax.nn.softplus(jax.random.normal(k4, (Cc,), jnp.float32)) + 0.5
        scale = gamma / jnp.sqrt(var + eps)
        shift = beta - mean * scale
        return scale, shift

    s1, b1 = bn_fold(keys[4], hidden)
    s2, b2 = bn_fold(keys[5], hidden)
    s3, b3 = bn_fold(keys[6], Cout)

    # ----- NHWC input / kernel-layout weights -----
    x_nhwc = jnp.transpose(x_nchw, (0, 2, 3, 1))
    w1 = jnp.transpose(w1_t[:, :, 0, 0], (1, 0))            # (Cin, hidden)
    wdw = jnp.transpose(wdw_t[:, 0, :, :], (1, 2, 0))        # (3, 3, hidden)
    w3 = jnp.transpose(w3_t[:, :, 0, 0], (1, 0))             # (hidden, Cout)

    # Packed operands built once per layer (not per forward call).
    params = pack_inverted_residual_params(
        w1, s1, b1, wdw, s2, b2, w3, s3, b3,
        W=W, stride=stride, dilation=dilation)

    out_nhwc = inverted_residual_pallas(
        x_nhwc, params, stride=stride, dilation=dilation, expand_ratio=expand_ratio)
    out_nhwc = jax.block_until_ready(out_nhwc)
    out_nchw = jnp.transpose(out_nhwc, (0, 3, 1, 2))

    # ----- pure-JAX reference mirroring the PyTorch forward (NCHW, unfolded BN scales) -----
    def reference(x):
        y = lax.conv_general_dilated(x, w1_t, (1, 1), 'VALID',
                                     dimension_numbers=('NCHW', 'OIHW', 'NCHW'))
        y = y * s1[None, :, None, None] + b1[None, :, None, None]
        y = y * jax.nn.sigmoid(y)
        y = lax.conv_general_dilated(y, wdw_t, (stride, stride),
                                     padding=[(dilation, dilation), (dilation, dilation)],
                                     rhs_dilation=(dilation, dilation),
                                     dimension_numbers=('NCHW', 'OIHW', 'NCHW'),
                                     feature_group_count=hidden)
        y = y * s2[None, :, None, None] + b2[None, :, None, None]
        y = y * jax.nn.sigmoid(y)
        y = lax.conv_general_dilated(y, w3_t, (1, 1), 'VALID',
                                     dimension_numbers=('NCHW', 'OIHW', 'NCHW'))
        y = y * s3[None, :, None, None] + b3[None, :, None, None]
        if stride == 1 and Cin == Cout:
            y = y + x
        return y

    ref = jax.block_until_ready(reference(x_nchw))
    err = float(jnp.max(jnp.abs(out_nchw - ref)))
    # bf16 MXU operands on the two pointwise convs + approx-reciprocal SiLU -> few e-3 drift
    assert err < 2e-2, f"max abs error vs reference: {err}"
    print("KERNEL_OK")
</pallas_src>

<mosaic_0001>
module attributes {stable_mosaic.version = 11 : i64} {
  func.func @probe(%arg0: memref<8x128xf32, #tpu.memory_space<vmem>>, %arg1: memref<8x128xf32, #tpu.memory_space<vmem>>) attributes {dimension_semantics = [], scalar_prefetch = 0 : i64, scratch_operands = 0 : i64, tpu.core_type = #tpu.core_type<tc>} {
    %c0 = arith.constant 0 : index
    %c0_0 = arith.constant 0 : index
    %0 = vector.load %arg0[%c0, %c0_0] : memref<8x128xf32, #tpu.memory_space<vmem>>, vector<8x128xf32>
    %c1_i32 = arith.constant 1 : i32
    %1 = tpu.dynamic_rotate %0 by %c1_i32 dim 1 : vector<8x128xf32>, i32 -> vector<8x128xf32>
    %c0_1 = arith.constant 0 : index
    %c0_2 = arith.constant 0 : index
    %2 = vector.load %arg1[%c0_1, %c0_2] : memref<8x128xf32, #tpu.memory_space<vmem>>, vector<8x128xf32>
    tpu.vector_store %arg1[%c0_1, %c0_2], %1 {strides = array<i32>} : memref<8x128xf32, #tpu.memory_space<vmem>>, vector<8x128xf32>,
    return
  }
}

</mosaic_0001>

<bundles_post_ra>
// kernel: tpu_custom_call.1
= control target key start
LH: loop header
LB: loop body
LE: loop exit
PB: predicated region body
PF: predicated region fallthrough
CT: control target
= control target key end

     0   :  { %6 = vsyncpa [#allocation3], 0  ;;  %s128_s0 = inlined_call_operand.hbm [shape: f32[8,128], index: 0, kind: input, shape index: {}]   ;;  %s129_s1 = inlined_call_operand.hbm [shape: f32[8,128], index: 1, kind: output, shape index: {}]  }
   0x1   :  { %7 = vsyncpa [#allocation4], 0  ;;  %s91_s6 = smov [#allocation2]   ;;  %s43_s10 = scalar_lea.hbm %s128_s0, 128 }
   0x2   :  { %s14_s7 = sshll.u32 %s91_s6, 4  ;;  %p44_p0 = scmp.ne.s32.totalorder %s128_s0, %s43_s10  ;;  %s15_s7 = int_to_ptr.vmem [resolvable:$true] %s14_s7 }
   0x3   :  { %p47_p1 = scmp.lt.u32.totalorder %s43_s10, %s128_s0 }
   0x5   :  { %p49_p2 = pnand %p47_p1, %p44_p0 }
   0x7   :  { %52 = shalt.err (!%p49_p2)
}
   0x8   :  { %s53_s15 = scalar_lea.vmem %s15_s7, 128  ;;  %p58_p4 = scmp.lt.s32.totalorder %s15_s7, %s15_s7 }
   0x9   :  { %p54_p3 = scmp.ne.s32.totalorder %s15_s7, %s53_s15  ;;  %p59_p5 = scmp.lt.s32.totalorder %s53_s15, %s53_s15 }
   0xb   :  { %p60_p6 = por %p59_p5, %p58_p4 }
   0xd   :  { %p61_p7 = pnand %p60_p6, %p54_p3 }
   0xf   :  { %64 = shalt.err (!%p61_p7)
}
  0x10   :  { %17 = dma.hbm_to_vmem [thread:$0]  %s128_s0, 128, %s15_s7, [#allocation3]  }
  0x11   :  { %87 = dma.done.wait [#allocation3], 128  }
  0x12   :  { %88 = vsyncadd [#allocation3], 4294967168  ;;  %v21_v0 = vld [vmem:[#allocation2] sm:$0xff]  ;;  %s92_s18 = smov 1   ;;  %s93_s19 = smov [#allocation5]  }
  0x13   :  { %22 = vrot.lane.b32.xlu0 %v21_v0, %s92_s18  ;;  %s31_s20 = sshll.u32 %s93_s19, 4  ;;  %s32_s20 = int_to_ptr.vmem [resolvable:$true] %s31_s20 }
  0x14   :  { %s65_s21 = scalar_lea.vmem %s32_s20, 128  ;;  %p70_p9 = scmp.lt.s32.totalorder %s32_s20, %s32_s20 }
  0x15   :  { %p66_p8 = scmp.ne.s32.totalorder %s32_s20, %s65_s21  ;;  %p71_p10 = scmp.lt.s32.totalorder %s65_s21, %s65_s21 }
  0x17   :  { %p72_p11 = por %p71_p10, %p70_p9 }
  0x19   :  { %p73_p12 = pnand %p72_p11, %p66_p8 }
  0x85   :  { %v23_v1 = vpop.permute.xlu0 %22 }
  0x86   :  { %24 = vst [vmem:[#allocation5] sm:$0xff] %v23_v1 }
  0x87   :  { %76 = shalt.err (!%p73_p12)
}
  0x88   :  { %s77_s0 = scalar_lea.hbm %s129_s1, 128 }
  0x89   :  { %p78_p13 = scmp.ne.s32.totalorder %s129_s1, %s77_s0  ;;  %p81_p0 = scmp.lt.u32.totalorder %s77_s0, %s129_s1 }
  0x8b   :  { %p83_p1 = pnand %p81_p0, %p78_p13 }
  0x8d   :  { %86 = shalt.err (!%p83_p1)
}
  0x8e   :  { %34 = dma.vmem_to_hbm [thread:$0]  %s32_s20, 128, %s129_s1, [#allocation4]  }
  0x8f   :  { %89 = dma.done.wait [#allocation4], 128  }
  0x90   :  { %90 = vsyncadd [#allocation4], 4294967168 }
  0x91   :  { %38 = vsyncpa [#allocation3], 1 }
  0x92   :  { %39 = vsyncpa [#allocation4], 1 }

</bundles_post_ra>
